<compile_context>
chip_gen: v7x
topology: tpu7x:2x2x1
jax: 0.10.0
libtpu: 0.0.40
codegen_flags: <defaults>
</compile_context>

<pallas_src>
import functools

import jax
import jax.numpy as jnp
from jax.experimental import pallas as pl
from jax.experimental.pallas import tpu as pltpu

_LANE = 128


def _round_up(x, m):
    return ((x + m - 1) // m) * m


def _pad_to(x, shape):
    pads = [(0, t - s) for s, t in zip(x.shape, shape)]
    if all(p == (0, 0) for p in pads):
        return x
    return jnp.pad(x, pads)


def _sage_layer_kernel(a_ref, xsrc_ref, xdst_ref, w_ref, b_ref, o_ref):
    # Mean aggregation over neighbors: bf16 MXU matmul, f32 accumulation.
    h_neigh = jnp.dot(a_ref[0], xsrc_ref[0], preferred_element_type=jnp.float32)
    # Add self features + ReLU in f32 (VPU elementwise).
    h = jnp.maximum(h_neigh + xdst_ref[0], 0.0)
    # Linear layer: cast activations to bf16 for the MXU, accumulate f32,
    # broadcast-add bias in f32.
    out = jnp.dot(h.astype(jnp.bfloat16), w_ref[...],
                  preferred_element_type=jnp.float32) + b_ref[...]
    o_ref[0] = out.astype(o_ref.dtype)


@functools.partial(jax.jit, static_argnames=("tm",))
def sage_layer_fused(a_stk, xsrc_stk, xdst_stk, w, b, *, tm=128):
    """out[h] = relu(A[h] @ xsrc[h] + xdst[h]) @ w + b  for every hop h.

    a_stk:    [n_hops, n_dst_pad, n_src_pad]  bf16 (row-normalized, zero-padded)
    xsrc_stk: [n_hops, n_src_pad, f_in]       bf16
    xdst_stk: [n_hops, n_dst_pad, f_in]       f32
    w:        [f_in, f_out]                   bf16
    b:        [1, f_out]                      f32
    """
    n_hops, n_dst, n_src = a_stk.shape
    f_in, f_out = w.shape
    assert n_dst % tm == 0 and n_src % _LANE == 0
    assert f_in % _LANE == 0 and f_out % _LANE == 0

    grid = (n_hops, n_dst // tm)

    # VMEM budget (double-buffered blocks) -> raise scoped limit with headroom.
    est = 2 * (tm * n_src * 2          # A tile (bf16)
               + n_src * f_in * 2      # x_src hop slab (bf16)
               + tm * f_in * 4         # x_dst tile (f32)
               + f_in * f_out * 2      # W (bf16, resident)
               + f_out * 4             # bias
               + tm * f_out * 4)       # out tile (f32)
    vmem_limit = min(max(est + (4 << 20), 32 << 20), 64 << 20)

    flops = 2 * n_hops * n_dst * (n_src * f_in + f_in * f_out)
    bytes_accessed = (a_stk.size * 2 + xsrc_stk.size * 2 + xdst_stk.size * 4
                      + w.size * 2 + b.size * 4 + n_hops * n_dst * f_out * 4)

    return pl.pallas_call(
        _sage_layer_kernel,
        out_shape=jax.ShapeDtypeStruct((n_hops, n_dst, f_out), jnp.float32),
        grid_spec=pltpu.PrefetchScalarGridSpec(
            num_scalar_prefetch=0,
            grid=grid,
            in_specs=[
                pl.BlockSpec((1, tm, n_src), lambda h, i: (h, i, 0)),    # A tile
                pl.BlockSpec((1, n_src, f_in), lambda h, i: (h, 0, 0)),  # src feats (per hop)
                pl.BlockSpec((1, tm, f_in), lambda h, i: (h, i, 0)),     # dst (self) feats
                pl.BlockSpec((f_in, f_out), lambda h, i: (0, 0)),        # W (resident)
                pl.BlockSpec((1, f_out), lambda h, i: (0, 0)),           # bias (resident)
            ],
            out_specs=pl.BlockSpec((1, tm, f_out), lambda h, i: (h, i, 0)),
        ),
        compiler_params=pltpu.CompilerParams(
            dimension_semantics=("parallel", "parallel"),
            vmem_limit_bytes=vmem_limit),
        cost_estimate=pl.CostEstimate(
            flops=flops, transcendentals=0, bytes_accessed=bytes_accessed),
    )(a_stk, xsrc_stk, xdst_stk, w, b)


def graphsage_nextdoor_forward(blocks, features, samples, w_list, b_list,
                               n_layers, *, tm=128):
    """Mirrors GraphSAGE_Nextdoor.forward (eval mode).

    blocks:   list of dense row-normalized adjacency matrices in DGL order
              (outermost hop first); reversed inside, like the PyTorch code.
    features: [num_nodes, in_feats] full feature table.
    samples:  list of n_layers+1 index arrays (node ids per hop).
    """
    blocks = list(blocks)[::-1]                       # blocks.reverse()
    hidden = [features[s] for s in samples]           # feature gather (glue)
    for layer in range(n_layers):
        n_hops = n_layers - layer
        w, bias = w_list[layer], b_list[layer]
        f_in, f_out = w.shape
        f_in_p = _round_up(f_in, _LANE)
        f_out_p = _round_up(f_out, _LANE)

        n_dst_list = [blocks[h].shape[0] for h in range(n_hops)]
        n_src_list = [blocks[h].shape[1] for h in range(n_hops)]
        n_dst_p = _round_up(max(n_dst_list), tm)
        n_src_p = _round_up(max(n_src_list), _LANE)

        # Pad every hop to a common shape and stack -> one pallas_call per layer.
        a_stk = jnp.stack(
            [_pad_to(blocks[h], (n_dst_p, n_src_p)) for h in range(n_hops)]
        ).astype(jnp.bfloat16)
        xsrc_stk = jnp.stack(
            [_pad_to(hidden[h + 1], (n_src_p, f_in_p)) for h in range(n_hops)]
        ).astype(jnp.bfloat16)
        xdst_stk = jnp.stack(
            [_pad_to(hidden[h], (n_dst_p, f_in_p)) for h in range(n_hops)]
        ).astype(jnp.float32)
        w_p = _pad_to(w, (f_in_p, f_out_p)).astype(jnp.bfloat16)
        b_p = _pad_to(bias, (1, f_out_p)).astype(jnp.float32)

        out = sage_layer_fused(a_stk, xsrc_stk, xdst_stk, w_p, b_p, tm=tm)
        hidden = [out[h, :n_dst_list[h], :f_out] for h in range(n_hops)]
    return hidden[0]


def _reference_forward(blocks, features, samples, w_list, b_list, n_layers):
    """Pure-JAX reference with the same bf16-input / f32-accumulate numerics."""
    blocks = list(blocks)[::-1]
    hidden = [features[s] for s in samples]
    for layer in range(n_layers):
        next_hidden = []
        for hop in range(n_layers - layer):
            h_neigh = jnp.dot(blocks[hop].astype(jnp.bfloat16),
                              hidden[hop + 1].astype(jnp.bfloat16),
                              preferred_element_type=jnp.float32)
            h = jnp.maximum(h_neigh + hidden[hop].astype(jnp.float32), 0.0)
            out = jnp.dot(h.astype(jnp.bfloat16),
                          w_list[layer].astype(jnp.bfloat16),
                          preferred_element_type=jnp.float32) + b_list[layer]
            next_hidden.append(out)
        hidden = next_hidden
    return hidden[0]


def _make_block(key, n_dst, n_src):
    """Dense row-normalized adjacency [n_dst, n_src], every dst has >= 1 neighbor."""
    mask = jax.random.bernoulli(key, p=0.4, shape=(n_dst, n_src)).astype(jnp.float32)
    rows = jnp.arange(n_dst)
    mask = mask.at[rows, rows % n_src].set(1.0)     # guarantee non-zero degree
    deg = mask.sum(axis=1, keepdims=True)
    return mask / deg


if __name__ == "__main__":
    key = jax.random.PRNGKey(0)
    (k_feat, k_s0, k_s1, k_s2, k_b0, k_b1,
     k_w0, k_w1, k_bias0, k_bias1) = jax.random.split(key, 10)

    num_nodes = 64
    in_feats, n_hidden, n_classes = 128, 256, 128
    n_layers = 2
    n0, n1, n2 = 8, 16, 32   # seed nodes, 1-hop nodes, 2-hop nodes

    features = jax.random.normal(k_feat, (num_nodes, in_feats), dtype=jnp.float32)
    samples = [
        jax.random.randint(k_s0, (n0,), 0, num_nodes),
        jax.random.randint(k_s1, (n1,), 0, num_nodes),
        jax.random.randint(k_s2, (n2,), 0, num_nodes),
    ]
    # DGL order: outermost block (s2 -> s1) first, innermost (s1 -> s0) last.
    blocks = [
        _make_block(k_b0, n1, n2),
        _make_block(k_b1, n0, n1),
    ]

    # Deterministic "Linear" params (stored pre-transposed: [in, out]).
    w_list = [
        0.1 * jax.random.normal(k_w0, (in_feats, n_hidden), dtype=jnp.float32),
        0.1 * jax.random.normal(k_w1, (n_hidden, n_classes), dtype=jnp.float32),
    ]
    b_list = [
        0.1 * jax.random.normal(k_bias0, (1, n_hidden), dtype=jnp.float32),
        0.1 * jax.random.normal(k_bias1, (1, n_classes), dtype=jnp.float32),
    ]

    out = graphsage_nextdoor_forward(blocks, features, samples, w_list, b_list, n_layers)
    out = jax.block_until_ready(out)
    assert out.shape == (n0, n_classes), out.shape

    ref = _reference_forward(blocks, features, samples, w_list, b_list, n_layers)
    assert jnp.allclose(out, ref, atol=2e-2, rtol=2e-2), "mismatch vs JAX reference"

    print("KERNEL_OK")
</pallas_src>

<mosaic_0001>
module attributes {stable_mosaic.version = 11 : i64} {
  func.func @_sage_layer_kernel(%arg0: i32, %arg1: i32, %arg2: memref<1x128x128xbf16, #tpu.memory_space<vmem>>, %arg3: memref<1x128x128xbf16, #tpu.memory_space<vmem>>, %arg4: memref<1x128x128xf32, #tpu.memory_space<vmem>>, %arg5: memref<128x256xbf16, #tpu.memory_space<vmem>>, %arg6: memref<1x256xf32, #tpu.memory_space<vmem>>, %arg7: memref<1x128x256xf32, #tpu.memory_space<vmem>>) attributes {dimension_semantics = [#tpu.dimension_semantics<parallel>, #tpu.dimension_semantics<parallel>], iteration_bounds = array<i64: 2, 1>, scalar_prefetch = 0 : i64, scratch_operands = 0 : i64, tpu.core_type = #tpu.core_type<tc>, window_params = [{transform_indices = @transform_0, window_bounds = array<i64: 1, 128, 128>}, {transform_indices = @transform_1, window_bounds = array<i64: 1, 128, 128>}, {transform_indices = @transform_2, window_bounds = array<i64: 1, 128, 128>}, {pipeline_mode = #tpu.pipeline_mode<synchronous>, transform_indices = @transform_3, window_bounds = array<i64: 128, 256>}, {pipeline_mode = #tpu.pipeline_mode<synchronous>, transform_indices = @transform_4, window_bounds = array<i64: 1, 256>}, {transform_indices = @transform_5, window_bounds = array<i64: 1, 128, 256>}]} {
    %c0 = arith.constant 0 : index
    %c0_0 = arith.constant 0 : index
    %c0_1 = arith.constant 0 : index
    %0 = vector.load %arg2[%c0, %c0_0, %c0_1] : memref<1x128x128xbf16, #tpu.memory_space<vmem>>, vector<1x128x128xbf16>
    %1 = vector.shape_cast %0 : vector<1x128x128xbf16> to vector<128x128xbf16>
    %c0_2 = arith.constant 0 : index
    %c0_3 = arith.constant 0 : index
    %c0_4 = arith.constant 0 : index
    %2 = vector.load %arg3[%c0_2, %c0_3, %c0_4] : memref<1x128x128xbf16, #tpu.memory_space<vmem>>, vector<1x128x128xbf16>
    %3 = vector.shape_cast %2 : vector<1x128x128xbf16> to vector<128x128xbf16>
    %cst = arith.constant dense<0.000000e+00> : vector<128x128xf32>
    %4 = tpu.matmul %1, %3, %cst {dimension_numbers = #tpu.dot_dimension_numbers<[1], [0], [0], [1], [0, 0, 1, 1], [], []>} : vector<128x128xbf16>, vector<128x128xbf16>, vector<128x128xf32> -> vector<128x128xf32>
    %c0_5 = arith.constant 0 : index
    %c0_6 = arith.constant 0 : index
    %c0_7 = arith.constant 0 : index
    %5 = vector.load %arg4[%c0_5, %c0_6, %c0_7] : memref<1x128x128xf32, #tpu.memory_space<vmem>>, vector<1x128x128xf32>
    %6 = vector.shape_cast %5 : vector<1x128x128xf32> to vector<128x128xf32>
    %7 = arith.addf %4, %6 : vector<128x128xf32>
    %cst_8 = arith.constant 0.000000e+00 : f32
    %8 = vector.broadcast %cst_8 : f32 to vector<128x128xf32>
    %9 = arith.maximumf %7, %8 : vector<128x128xf32>
    %10 = arith.truncf %9 : vector<128x128xf32> to vector<128x128xbf16>
    %c0_9 = arith.constant 0 : index
    %c0_10 = arith.constant 0 : index
    %11 = vector.load %arg5[%c0_9, %c0_10] : memref<128x256xbf16, #tpu.memory_space<vmem>>, vector<128x256xbf16>
    %cst_11 = arith.constant dense<0.000000e+00> : vector<128x256xf32>
    %12 = tpu.matmul %10, %11, %cst_11 {dimension_numbers = #tpu.dot_dimension_numbers<[1], [0], [0], [1], [0, 0, 1, 1], [], []>} : vector<128x128xbf16>, vector<128x256xbf16>, vector<128x256xf32> -> vector<128x256xf32>
    %c0_12 = arith.constant 0 : index
    %c0_13 = arith.constant 0 : index
    %13 = vector.load %arg6[%c0_12, %c0_13] : memref<1x256xf32, #tpu.memory_space<vmem>>, vector<1x256xf32>
    %14 = vector.broadcast %13 : vector<1x256xf32> to vector<128x256xf32>
    %15 = arith.addf %12, %14 : vector<128x256xf32>
    %c0_14 = arith.constant 0 : index
    %c0_15 = arith.constant 0 : index
    %c0_16 = arith.constant 0 : index
    %16 = vector.load %arg7[%c0_14, %c0_15, %c0_16] : memref<1x128x256xf32, #tpu.memory_space<vmem>>, vector<1x128x256xf32>
    %17 = vector.shape_cast %16 : vector<1x128x256xf32> to vector<128x256xf32>
    %18 = vector.shape_cast %15 : vector<128x256xf32> to vector<1x128x256xf32>
    tpu.vector_store %arg7[%c0_14, %c0_15, %c0_16], %18 {strides = array<i32>} : memref<1x128x256xf32, #tpu.memory_space<vmem>>, vector<1x128x256xf32>,
    return
  }
  func.func @transform_0(%arg0: i32, %arg1: i32) -> (i32, i32, i32) {
    %c0_i32 = arith.constant 0 : i32
    %c0_i32_0 = arith.constant 0 : i32
    return %arg0, %arg1, %c0_i32 : i32, i32, i32
  }
  func.func @transform_1(%arg0: i32, %arg1: i32) -> (i32, i32, i32) {
    %c0_i32 = arith.constant 0 : i32
    %c0_i32_0 = arith.constant 0 : i32
    %c0_i32_1 = arith.constant 0 : i32
    return %arg0, %c0_i32, %c0_i32_0 : i32, i32, i32
  }
  func.func @transform_2(%arg0: i32, %arg1: i32) -> (i32, i32, i32) {
    %c0_i32 = arith.constant 0 : i32
    %c0_i32_0 = arith.constant 0 : i32
    return %arg0, %arg1, %c0_i32 : i32, i32, i32
  }
  func.func @transform_3(%arg0: i32, %arg1: i32) -> (i32, i32) {
    %c0_i32 = arith.constant 0 : i32
    %c0_i32_0 = arith.constant 0 : i32
    %c0_i32_1 = arith.constant 0 : i32
    return %c0_i32, %c0_i32_0 : i32, i32
  }
  func.func @transform_4(%arg0: i32, %arg1: i32) -> (i32, i32) {
    %c0_i32 = arith.constant 0 : i32
    %c0_i32_0 = arith.constant 0 : i32
    %c0_i32_1 = arith.constant 0 : i32
    return %c0_i32, %c0_i32_0 : i32, i32
  }
  func.func @transform_5(%arg0: i32, %arg1: i32) -> (i32, i32, i32) {
    %c0_i32 = arith.constant 0 : i32
    %c0_i32_0 = arith.constant 0 : i32
    return %arg0, %arg1, %c0_i32 : i32, i32, i32
  }
}

</mosaic_0001>

<bundles_post_ra>
// kernel: sage_layer_fused.1
= control target key start
LH: loop header
LB: loop body
LE: loop exit
PB: predicated region body
PF: predicated region fallthrough
CT: control target
= control target key end

     0   :  { %s1983_s0 = inlined_call_operand.hbm [shape: bf16[2,128,128], index: 0, kind: input, shape index: {}]   ;;  %s1984_s1 = inlined_call_operand.hbm [shape: bf16[2,128,128], index: 1, kind: input, shape index: {}]   ;;  %s1985_s2 = inlined_call_operand.hbm [shape: f32[2,128,128], index: 2, kind: input, shape index: {}]   ;;  %s1986_s3 = inlined_call_operand.hbm [shape: bf16[128,256], index: 3, kind: input, shape index: {}]   ;;  %s1987_s4 = inlined_call_operand.vmem [shape: f32[1,256], index: 4, kind: input, shape index: {}]   ;;  %s1988_s5 = inlined_call_operand.hbm [shape: f32[2,128,256], index: 5, kind: output, shape index: {}]  }
   0x1   :  { %2006 = sst [smem:[#allocation21_spill]] %s1984_s1 }
   0x2   :  { %10 = vsyncpa [#allocation3], 0 }
   0x3   :  { %12 = vsyncpa [#allocation3 + $0x1], 0 }
   0x4   :  { %13 = vsyncpa [#allocation6], 0 }
   0x5   :  { %15 = vsyncpa [#allocation6 + $0x1], 0 }
   0x6   :  { %16 = vsyncpa [#allocation9], 0 }
   0x7   :  { %17 = vsyncpa [#allocation4], 0 }
   0x8   :  { %19 = vsyncpa [#allocation4 + $0x1], 0  ;;  %s1546_s18 = smov 0   ;;  %s1548_s19 = smov 0  }
   0x9   :  { %s1550_s20 = smov 0   ;;  %s1552_s21 = smov 0  }
   0xa   :  { %s1554_s22 = smov 0   ;;  %s1556_s23 = smov 0  }
   0xb LB: > { %2007 = sst [smem:[#allocation15_spill]] %s1482_s18  ;;  %s37_s24 = sadd.s32 1, %s1498_s22  ;;  %s1502_s23 = sphi %s1556_s23, %s25_s23   ;;  %s1498_s22 = sphi %s1554_s22, %s2043_s22   ;;  %s1494_s21 = sphi %s1552_s21, %s2042_s21   ;;  %s1490_s20 = sphi %s1550_s20, %s2038_s20   ;;  %s1486_s19 = sphi %s1548_s19, %s2041_s19   ;;  %s1482_s18 = sphi %s1546_s18, %s2040_s18  }
   0xc   : > { %2008 = sst [smem:[#allocation16_spill]] %s1490_s20  ;;  %s46_s25 = sadd.s32 1, %s1490_s20 }
   0xd   : > { %2009 = sst [smem:[#allocation17_spill]] %s1502_s23  ;;  %p39_p0 = scmp.ge.s32.totalorder %s37_s24, 2 }
   0xe   : > { %p1989_p1 = scmp.ne.s32.totalorder %s1490_s20, %s1486_s19  ;;  %p54_p2 = scmp.eq.s32.totalorder %s1502_s23, 0 }
   0xf   : > { %s2045_s24 = smov (%p39_p0, %s37_s24), 0  ;;  %p1195_p5 = scmp.lt.s32.totalorder %s1502_s23, 2 }
  0x10   : > { %2010 = sst [smem:[#allocation18_spill]] %s2045_s24  ;;  %p55_p4 = por %p54_p2, %p1989_p1 }
  0x11   : > { %s41_s26 = ssub.s32 %s1498_s22, %s2045_s24  ;;  %s1591_s27 = sand.u32 1, %s1490_s20  }
  0x12   : > { %p44_p6 = scmp.eq.s32.totalorder %s41_s26, 0  ;;  %s1044_s28 = sshll.u32 %s1591_s27, 6 }
  0x13   : > { %s1096_s29 = sshll.u32 %s1498_s22, 10  ;;  %p1595_p7 = pnand %p1195_p5, %p55_p4 }
  0x14   : > { %s1600_s6 = scalar_select %p44_p6, %s1490_s20, %s46_s25  }
  0x15   : > { %s2011_s30 = scalar_select %p1595_p7, 1, 0 }
  0x16   : > { %2012 = sst [smem:[#allocation19_spill]] %s1600_s6  ;;  %s246_s7 = sand.u32 1, %s1502_s23  }
  0x17   : > { %s2013_s1 = sld [smem:[#allocation21_spill]]  ;;  %s250_s11 = scalar_lea.vmem [#allocation5], %s1044_s28 }
  0x18   : > { %s257_s12 = sshll.u32 %s250_s11, 4  ;;  %s1614_s13 = scalar_lea.sflag [#allocation6], %s246_s7  ;;  %s1612_s12 = int_to_ptr.vmem [resolvable:$true] %s257_s12 }
  0x19   : > { %p1620_p9 = pneg %p1595_p7 }
  0x1b   : > { %s2014_s15 = scalar_select %p1620_p9, 1, 0 }
  0x1d   : > { %s1608_s10 = scalar_lea.hbm %s2013_s1, %s1096_s29  ;;  %s1299_s25 = scalar_lea.hbm %s2013_s1, 2048 }
  0x1e   : > { %s1294_s14 = scalar_lea.hbm %s1608_s10, 1024  ;;  %p1300_p12 = scmp.lt.u32.totalorder %s1608_s10, %s2013_s1 }
  0x1f   : > { %p1295_p8 = scmp.ne.s32.totalorder %s1608_s10, %s1294_s14  ;;  %p1301_p13 = scmp.lt.u32.totalorder %s1299_s25, %s1294_s14 }
  0x20   : > { %p1303_p2 = scmp.lt.u32.totalorder %s1294_s14, %s1608_s10 }
  0x21   : > { %p1297_p10 = pnand %p1620_p9, %p1295_p8  ;;  %p1302_p0 = por %p1301_p13, %p1300_p12 }
  0x23   : > { %p1298_p11 = pneg %p1297_p10  ;;  %p1304_p4 = por %p1303_p2, %p1302_p0 }
  0x25   : > { %p1305_p5 = pnand %p1304_p4, %p1298_p11 }
  0x27   : > { %1308 = shalt.err (!%p1305_p5)
}
  0x28   : > { %s1309_s7 = scalar_lea.vmem %s1612_s12, 1024  ;;  %s1504_s9 = smov [#allocation5]  }
  0x29   : > { %p1310_p6 = scmp.ne.s32.totalorder %s1612_s12, %s1309_s7  ;;  %s1314_s11 = sshll.u32 %s1504_s9, 4  ;;  %s1315_s11 = int_to_ptr.vmem [resolvable:$false] %s1314_s11 }
  0x2a   : > { %s1316_s16 = scalar_lea.vmem %s1315_s11, 2048  ;;  %p1317_p3 = scmp.lt.s32.totalorder %s1612_s12, %s1315_s11 }
  0x2b   : > { %p1312_p8 = pnand %p1310_p6, %p1620_p9  ;;  %p1318_p1 = scmp.lt.s32.totalorder %s1316_s16, %s1309_s7 }
  0x2d   : > { %p1313_p10 = pneg %p1312_p8  ;;  %p1319_p12 = por %p1318_p1, %p1317_p3 }
  0x2f   : > { %p1320_p13 = pnand %p1319_p12, %p1313_p10 }
  0x31   : > { %1323 = shalt.err (!%p1320_p13)
}
  0x32   : > { %s1990_s14 = smov 64   ;;  %s1991_s17 = smov 4  }
  0x33   : > { %1186 = dma.hbm_to_vmem [thread:$0]  (!%p1595_p7), %s1608_s10, 1024, %s1612_s12, %s1614_s13, %s1990_s14, %s1990_s14, %s1991_s17  }
  0x34   : > { %s1648_s25 = sadd.s32 4294967295, %s1502_s23   ;;  %s1040_s26 = sadd.s32 4294967294, %s1502_s23  }
  0x35   : > { %p59_p1 = scmp.ne.s32.totalorder %s1486_s19, %s1482_s18  ;;  %p1998_p3 = scmp.eq.s32.totalorder %s1648_s25, 0 }
  0x36   : > { %p181_p11 = scmp.eq.s32.totalorder %s1648_s25, 1  ;;  %p187_p0 = scmp.eq.s32.totalorder %s1040_s26, 1 }
  0x37   : > { %p1041_p2 = scmp.ge.s32.totalorder %s1502_s23, 1  ;;  %p1658_p4 = por %p1998_p3, %p59_p1 }
  0x38   : > { %p2016_p5 = scmp.ne.s32.totalorder %s1490_s20, %s1486_s19  ;;  %p1669_p8 = por %p187_p0, %p59_p1 }
  0x39   : > { %s2015_s8 = scalar_select %p1658_p4, 1, 0 }
  0x3a   : > { %p1665_p6 = por %p181_p11, %p2016_p5  ;;  %p194_p10 = scmp.lt.s32.totalorder %s1502_s23, 3 }
  0x3b   : > { %s2018_s12 = scalar_select %p1669_p8, 1, 0 }
  0x3c   : > { %s2017_s10 = scalar_select %p1665_p6, 1, 0 }
  0x3d   : > { %2019 = sst [smem:[#allocation20_spill]] %s2018_s12  ;;  %p1674_p12 = pnand %p1041_p2, %p194_p10 }
  0x3e   : > { %s1507_s9 = smov [#allocation8]   ;;  %s1693_s17 = scalar_lea.hbm %s1983_s0, %s1096_s29 }
  0x3f   : > { %s2020_s7 = scalar_select %p1674_p12, 1, 0 }
  0x40   : > { %s206_s11 = sshll.u32 %s1507_s9, 4  ;;  %p1176_p13 = pneg %p1674_p12  ;;  %s1678_s11 = int_to_ptr.vmem [resolvable:$true] %s206_s11 }
  0x41   : > { %s227_s1 = scalar_lea.vmem [#allocation2], %s1044_s28  ;;  %s1324_s23 = scalar_lea.hbm %s1986_s3, 2048 }
  0x42   : > { %p1684_p11 = pnand %p1176_p13, %p1998_p3  ;;  %s236_s24 = sshll.u32 %s227_s1, 4  ;;  %s1698_s24 = int_to_ptr.vmem [resolvable:$true] %s236_s24 }
  0x43   : > { %p1325_p1 = scmp.ne.s32.totalorder %s1986_s3, %s1324_s23  ;;  %p1331_p10 = scmp.lt.u32.totalorder %s1324_s23, %s1986_s3 }
  0x44   : > { %p1326_p0 = pneg %p1684_p11 }
  0x46   : > { %p1327_p2 = pnand %p1326_p0, %p1325_p1 }
  0x48   : > { %p1328_p5 = pneg %p1327_p2 }
  0x4a   : > { %p1333_p13 = pnand %p1331_p10, %p1328_p5 }
  0x4c   : > { %1336 = shalt.err (!%p1333_p13)
}
  0x4d   : > { %s1337_s1 = scalar_lea.vmem %s1678_s11, 2048  ;;  %p1345_p4 = scmp.lt.s32.totalorder %s1678_s11, %s1678_s11 }
  0x4e   : > { %p1338_p3 = scmp.ne.s32.totalorder %s1678_s11, %s1337_s1  ;;  %p1346_p12 = scmp.lt.s32.totalorder %s1337_s1, %s1337_s1 }
  0x50   : > { %p1340_p8 = pnand %p1338_p3, %p1326_p0  ;;  %p1347_p7 = por %p1346_p12, %p1345_p4 }
  0x52   : > { %p1341_p6 = pneg %p1340_p8 }
  0x54   : > { %p1348_p9 = pnand %p1347_p7, %p1341_p6 }
  0x56   : > { %1351 = shalt.err (!%p1348_p9)
}
  0x57   : > { %s1508_s18 = smov 128   ;;  %s1509_s20 = smov 8  }
  0x58   : > { %1179 = dma.hbm_to_vmem [thread:$0]  (!%p1684_p11), %s1986_s3, 2048, %s1678_s11, [#allocation9], %s1508_s18, %s1508_s18, %s1509_s20  }
  0x59   : > { %s224_s6 = scalar_lea.sflag [#allocation3], %s1591_s27  ;;  %s1352_s12 = scalar_lea.hbm %s1693_s17, 1024 }
  0x5a   : > { %p1353_p7 = scmp.ne.s32.totalorder %s1693_s17, %s1352_s12  ;;  %p2022_p9 = scmp.ne.s32.totalorder %s2014_s15, 0 }
  0x5b   : > { %s1357_s14 = scalar_lea.hbm %s1983_s0, 2048  ;;  %p1358_p6 = scmp.lt.u32.totalorder %s1693_s17, %s1983_s0 }
  0x5c   : > { %p1355_p3 = pnand %p1353_p7, %p2022_p9  ;;  %p1359_p8 = scmp.lt.u32.totalorder %s1357_s14, %s1352_s12 }
  0x5d   : > { %p1361_p1 = scmp.lt.u32.totalorder %s1352_s12, %s1693_s17 }
  0x5e   : > { %p1356_p4 = pneg %p1355_p3  ;;  %p1360_p12 = por %p1359_p8, %p1358_p6 }
  0x60   : > { %p1362_p0 = por %p1361_p1, %p1360_p12 }
  0x62   : > { %p1363_p2 = pnand %p1362_p0, %p1356_p4 }
  0x64   : > { %1366 = shalt.err (!%p1363_p2)
}
  0x65   : > { %s1367_s11 = scalar_lea.vmem %s1698_s24, 1024  ;;  %s1510_s16 = smov [#allocation2]  }
  0x66   : > { %p1368_p11 = scmp.ne.s32.totalorder %s1698_s24, %s1367_s11  ;;  %s1372_s23 = sshll.u32 %s1510_s16, 4  ;;  %s1373_s23 = int_to_ptr.vmem [resolvable:$false] %s1372_s23 }
  0x67   : > { %s1374_s9 = scalar_lea.vmem %s1373_s23, 2048  ;;  %p1375_p13 = scmp.lt.s32.totalorder %s1698_s24, %s1373_s23 }
  0x68   : > { %p1370_p5 = pnand %p1368_p11, %p2022_p9  ;;  %p1376_p7 = scmp.lt.s32.totalorder %s1374_s9, %s1367_s11 }
  0x6a   : > { %p1371_p10 = pneg %p1370_p5  ;;  %p1377_p3 = por %p1376_p7, %p1375_p13 }
  0x6c   : > { %p1378_p6 = pnand %p1377_p3, %p1371_p10 }
  0x6e   : > { %1381 = shalt.err (!%p1378_p6)
}
  0x6f   : > { %p2023_p4 = scmp.ne.s32.totalorder %s2011_s30, 0  ;;  %s2024_s28 = smov 4  }
  0x70   : > { %s2025_s12 = smov 64   ;;  %s1098_s26 = sshll.u32 %s1498_s22, 11 }
  0x71   : > { %1183 = dma.hbm_to_vmem [thread:$0]  (!%p2023_p4), %s1693_s17, 1024, %s1698_s24, %s224_s6, %s2025_s12, %s2025_s12, %s2024_s28  }
  0x72   : > { %s1755_s1 = scalar_lea.hbm %s1985_s2, %s1098_s26  ;;  %s2026_s11 = sshll.u32 %s1591_s27, 7 }
  0x73   : > { %s271_s16 = scalar_lea.vmem [#allocation7], %s2026_s11  ;;  %s1382_s9 = scalar_lea.hbm %s1755_s1, 2048 }
  0x74   : > { %s280_s23 = sshll.u32 %s271_s16, 4  ;;  %p1383_p8 = scmp.ne.s32.totalorder %s1755_s1, %s1382_s9  ;;  %s1759_s23 = int_to_ptr.vmem [resolvable:$true] %s280_s23 }
  0x75   : > { %s1387_s6 = scalar_lea.hbm %s1985_s2, 4096  ;;  %p1388_p0 = scmp.lt.u32.totalorder %s1755_s1, %s1985_s2 }
  0x76   : > { %p1385_p12 = pnand %p1383_p8, %p2022_p9  ;;  %p1389_p2 = scmp.lt.u32.totalorder %s1387_s6, %s1382_s9 }
  0x77   : > { %p1391_p5 = scmp.lt.u32.totalorder %s1382_s9, %s1755_s1 }
  0x78   : > { %p1386_p1 = pneg %p1385_p12  ;;  %p1390_p11 = por %p1389_p2, %p1388_p0 }
  0x7a   : > { %p1392_p10 = por %p1391_p5, %p1390_p11 }
  0x7c   : > { %p1393_p13 = pnand %p1392_p10, %p1386_p1 }
  0x7e   : > { %1396 = shalt.err (!%p1393_p13)
}
  0x7f   : > { %s1397_s27 = scalar_lea.vmem %s1759_s23, 2048  ;;  %s1511_s26 = smov [#allocation7]  }
  0x80   : > { %p1398_p7 = scmp.ne.s32.totalorder %s1759_s23, %s1397_s27  ;;  %s1402_s29 = sshll.u32 %s1511_s26, 4  ;;  %s1403_s29 = int_to_ptr.vmem [resolvable:$false] %s1402_s29 }
  0x81   : > { %s1404_s14 = scalar_lea.vmem %s1403_s29, 4096  ;;  %p1405_p8 = scmp.lt.s32.totalorder %s1759_s23, %s1403_s29 }
  0x82   : > { %p1400_p3 = pnand %p1398_p7, %p2022_p9  ;;  %p1406_p12 = scmp.lt.s32.totalorder %s1404_s14, %s1397_s27 }
  0x84   : > { %p1401_p6 = pneg %p1400_p3  ;;  %p1407_p0 = por %p1406_p12, %p1405_p8 }
  0x86   : > { %p1408_p2 = pnand %p1407_p0, %p1401_p6 }
  0x88   : > { %1411 = shalt.err (!%p1408_p2)
}
  0x89   : > { %1189 = dma.hbm_to_vmem [thread:$0]  (!%p2023_p4), %s1755_s1, 2048, %s1759_s23, %s1614_s13, %s1508_s18, %s1508_s18, %s1509_s20  }
  0x8a   : > { %p2027_p9 = scmp.ne.s32.totalorder %s2020_s7, 0 }
  0x8b   : > { %s1789_s15 = sand.u32 (!%p2027_p9), 1, %s1486_s19   ;;  %p2028_p1 = scmp.ne.s32.totalorder (!%p2027_p9), %s2015_s8, 0 }
  0x8c   : > { %292 = sbr.rel (%p2027_p9) target bundleno = 688 (0x2b0), region = 40  ;;  %s1054_s11 = sshll.u32 (!%p2027_p9), %s1789_s15, 6 }
  0x8d   : > { %s295_s16 = scalar_lea.sflag (!%p2027_p9), [#allocation3], %s1789_s15  ;;  %s1793_s9 = scalar_lea.vmem (!%p2027_p9), [#allocation2], %s1054_s11 }
  0x93   : > { %1465 = dma.done.wait (%p2028_p1), %s295_s16, 1024  }
  0x94   : > { %1467 = vsyncadd (%p2028_p1), %s295_s16, 4294966272  ;;  %s303_s30 = sand.u32 1, %s1648_s25   ;;  %s1800_s7 = scalar_lea.vmem [#allocation5], %s1054_s11 }
  0x95   : > { %s304_s13 = scalar_lea.sflag [#allocation6], %s303_s30 }
  0x96   : > { %1469 = dma.done.wait (%p2028_p1), %s304_s13, 3072  }
  0x97   : > { %1471 = vsyncadd (%p2028_p1), %s304_s13, 4294964224  ;;  %s1056_s18 = sshll.u32 %s1789_s15, 7  ;;  %p2029_p4 = scmp.eq.s32.totalorder %s1648_s25, 0 }
  0x98   : > { %s1807_s20 = scalar_lea.vmem [#allocation7], %s1056_s18 }
  0x99   : > { %1473 = dma.done.wait (%p2029_p4), [#allocation9], 2048   ;;  %p2030_p11 = pmov %p2029_p4 }
  0x9a   : > { %v1254_v0 = vld [vmem:[%s1800_s7] sm:$0xff]   ;;  %v1255_v1 = vld [vmem:[%s1800_s7 + $0x8] sm:$0xff]   ;;  %v1256_v2 = vld [vmem:[%s1800_s7 + $0x10] sm:$0xff]   ;;  %v1512_v32 = vmov 0   ;;  %s1058_s1 = sshll.u32 %s1789_s15, 8  ;;  %s1099_s24 = sshll.u32 %s1494_s21, 12 }
  0x9b   : > { %1475 = vsyncadd (%p2030_p11), [#allocation9], 4294965248  ;;  %1116 = vmatprep.subr.bf16.mxu0 %v1254_v0  ;;  %v1257_v3 = vld [vmem:[%s1800_s7 + $0x18] sm:$0xff]   ;;  %v1262_v4 = vld [vmem:[%s1793_s9] sm:$0xff]   ;;  %786 = vmatprep.mubr.bf16.mxu1 %v1512_v32  ;;  %s1863_s23 = scalar_lea.vmem [#allocation10], %s1058_s1  ;;  %s1928_s12 = scalar_lea.hbm %s1988_s5, %s1099_s24 }
  0x9c   : > { %1117 = vmatpush3.bf16.msra.mxu0 %v1254_v0  ;;  %1132 = vmatprep.mubr.bf16.mxu0 %v1262_v4  ;;  %v1258_v5 = vld [vmem:[%s1800_s7 + $0x20] sm:$0xff]   ;;  %v1259_v6 = vld [vmem:[%s1800_s7 + $0x28] sm:$0xff]   ;;  %v1275_v9 = vld [vmem:[#allocation8 + $0x14] ss:$8 sps:$4 sm:$0xff]   ;;  %s896_s17 = sshll.u32 %s1863_s23, 4  ;;  %s880_s21 = scalar_lea.sflag [#allocation4], %s1789_s15  ;;  %s1930_s17 = int_to_ptr.vmem [resolvable:$true] %s896_s17 }
  0x9d   : > { %1118 = vmatprep.subr.bf16.mxu0 %v1255_v1  ;;  %v1272_v7 = vld [vmem:[#allocation8 + $0x4] ss:$8 sps:$4 sm:$0xff]   ;;  %v1270_v8 = vld [vmem:[#allocation8] ss:$8 sps:$4 sm:$0xff]   ;;  %v1260_v10 = vld [vmem:[%s1800_s7 + $0x30] sm:$0xff]   ;;  %s1412_s27 = scalar_lea.vmem %s1930_s17, 4096 }
  0x9e   : > { %1148 = vmatprep.subr.bf16.mxu1 %v1272_v7  ;;  %v1273_v11 = vld [vmem:[#allocation8 + $0x10] ss:$8 sps:$4 sm:$0xff]   ;;  %v1278_v12 = vld [vmem:[#allocation8 + $0x24] ss:$8 sps:$4 sm:$0xff]   ;;  %v1276_v14 = vld [vmem:[#allocation8 + $0x20] ss:$8 sps:$4 sm:$0xff]   ;;  %p1413_p5 = scmp.ne.s32.totalorder %s1930_s17, %s1412_s27 }
  0x9f   : > { %1156 = vmatpush1.bf16.msra.mxu1 %v1270_v8  ;;  %v1261_v13 = vld [vmem:[%s1800_s7 + $0x38] sm:$0xff]   ;;  %v1263_v16 = vld [vmem:[%s1793_s9 + $0x8] sm:$0xff]   ;;  %v1264_v18 = vld [vmem:[%s1793_s9 + $0x10] sm:$0xff]   ;;  %p2031_p10 = scmp.ne.s32.totalorder %s2017_s10, 0  ;;  %s1513_s26 = smov [#allocation10]  }
  0xa0   : > { %1119 = vmatpush3.bf16.msra.mxu0 %v1255_v1  ;;  %1149 = vmatprep.subr.bf16.mxu1 %v1275_v9  ;;  %v1281_v15 = vld [vmem:[#allocation8 + $0x34] ss:$8 sps:$4 sm:$0xff]   ;;  %v1279_v17 = vld [vmem:[#allocation8 + $0x30] ss:$8 sps:$4 sm:$0xff]   ;;  %v1284_v19 = vld [vmem:[#allocation8 + $0x44] ss:$8 sps:$4 sm:$0xff]  }
  0xa1   : > { %1120 = vmatprep.subr.bf16.mxu0 %v1256_v2  ;;  %v1282_v20 = vld [vmem:[#allocation8 + $0x40] ss:$8 sps:$4 sm:$0xff]   ;;  %v1287_v21 = vld [vmem:[#allocation8 + $0x54] ss:$8 sps:$4 sm:$0xff]   ;;  %v1285_v23 = vld [vmem:[#allocation8 + $0x50] ss:$8 sps:$4 sm:$0xff]   ;;  %p1414_p13 = pnand %p1413_p5, %p2031_p10 }
  0xa2   : > { %v1265_v22 = vld [vmem:[%s1793_s9 + $0x18] sm:$0xff]   ;;  %v1266_v24 = vld [vmem:[%s1793_s9 + $0x20] sm:$0xff]   ;;  %v1267_v25 = vld [vmem:[%s1793_s9 + $0x28] sm:$0xff]   ;;  %s1416_s29 = sshll.u32 %s1513_s26, 4  ;;  %s1417_s29 = int_to_ptr.vmem [resolvable:$false] %s1416_s29 }
  0xa3   : > { %1157 = vmatpush1.bf16.msra.mxu1 %v1273_v11  ;;  %v1268_v26 = vld [vmem:[%s1793_s9 + $0x30] sm:$0xff]   ;;  %v1269_v27 = vld [vmem:[%s1793_s9 + $0x38] sm:$0xff]   ;;  %v1290_v28 = vld [vmem:[#allocation8 + $0x64] ss:$8 sps:$4 sm:$0xff]   ;;  %p1415_p7 = pneg %p1414_p13  ;;  %s1418_s14 = scalar_lea.vmem %s1417_s29, 8192 }
  0xa4   : > { %1121 = vmatpush3.bf16.msra.mxu0 %v1256_v2  ;;  %1150 = vmatprep.subr.bf16.mxu1 %v1278_v12  ;;  %v1288_v29 = vld [vmem:[#allocation8 + $0x60] ss:$8 sps:$4 sm:$0xff]   ;;  %v1293_v30 = vld [vmem:[#allocation8 + $0x74] ss:$8 sps:$4 sm:$0xff]   ;;  %v1291_v31 = vld [vmem:[#allocation8 + $0x70] ss:$8 sps:$4 sm:$0xff]   ;;  %p1419_p3 = scmp.lt.s32.totalorder %s1930_s17, %s1417_s29  ;;  %p1420_p6 = scmp.lt.s32.totalorder %s1418_s14, %s1412_s27 }
  0xa5   : > { %1122 = vmatprep.subr.bf16.mxu0 %v1257_v3  ;;  %v395_v33 = vld [vmem:[%s1807_s20 + $0x10] sm:$0xff]  ;;  %v393_v34 = vld [vmem:[%s1807_s20] sm:$0xff]  ;;  %v396_v36 = vld [vmem:[%s1807_s20 + $0x18] sm:$0xff] }
  0xa6   : > { %v394_v39 = vld [vmem:[%s1807_s20 + $0x8] sm:$0xff]  ;;  %v399_v49 = vld [vmem:[%s1807_s20 + $0x30] sm:$0xff]  ;;  %v397_v51 = vld [vmem:[%s1807_s20 + $0x20] sm:$0xff]  ;;  %p1421_p8 = por %p1420_p6, %p1419_p3 }
  0xa7   : > { %1158 = vmatpush1.bf16.msra.mxu1 %v1276_v14  ;;  %v400_v54 = vld [vmem:[%s1807_s20 + $0x38] sm:$0xff]  ;;  %v398_v57 = vld [vmem:[%s1807_s20 + $0x28] sm:$0xff] }
  0xa8   : > { %1123 = vmatpush3.bf16.msra.mxu0 %v1257_v3  ;;  %1151 = vmatprep.subr.bf16.mxu1 %v1281_v15  ;;  %v403_v3 = vld [vmem:[%s1807_s20 + $0x50] sm:$0xff]  ;;  %p1422_p12 = pnand %p1421_p8, %p1415_p7 }
  0xa9   : > { %1124 = vmatprep.subr.bf16.mxu0 %v1258_v5 }
  0xab   : > { %1159 = vmatpush1.bf16.msra.mxu1 %v1279_v17 }
  0xac   : > { %1125 = vmatpush3.bf16.msra.mxu0 %v1258_v5  ;;  %1152 = vmatprep.subr.bf16.mxu1 %v1284_v19  ;;  %v401_v5 = vld [vmem:[%s1807_s20 + $0x40] sm:$0xff] }
  0xad   : > { %1126 = vmatprep.subr.bf16.mxu0 %v1259_v6 }
  0xaf   : > { %1160 = vmatpush1.bf16.msra.mxu1 %v1282_v20 }
  0xb0   : > { %1127 = vmatpush3.bf16.msra.mxu0 %v1259_v6  ;;  %1153 = vmatprep.subr.bf16.mxu1 %v1287_v21 }
  0xb1   : > { %1128 = vmatprep.subr.bf16.mxu0 %v1260_v10 }
  0xb3   : > { %1161 = vmatpush1.bf16.msra.mxu1 %v1285_v23 }
  0xb4   : > { %1129 = vmatpush3.bf16.msra.mxu0 %v1260_v10  ;;  %1154 = vmatprep.subr.bf16.mxu1 %v1290_v28 }
  0xb5   : > { %1130 = vmatprep.subr.bf16.mxu0 %v1261_v13 }
  0xb7   : > { %1162 = vmatpush1.bf16.msra.mxu1 %v1288_v29 }
  0xb8   : > { %1131 = vmatpush3.bf16.msra.mxu0 %v1261_v13  ;;  %1155 = vmatprep.subr.bf16.mxu1 %v1293_v30 }
  0xb9   : > { %734 = vmatprep.subr.bf16.mxu0 %v1272_v7 }
  0xbb   : > { %1133 = vmatmul.mubr.bf16.vlgmr.msra.gmra.mrb[0].mxu0 %v1263_v16  ;;  %1163 = vmatpush1.bf16.msra.mxu1 %v1291_v31 }
  0xbc   : > { %1136 = vmatprep.mubr.bf16.mxu0 %v1264_v18  ;;  %735 = vmatpush1.bf16.msra.mxu0 %v1270_v8  ;;  %v404_v8 = vld [vmem:[%s1807_s20 + $0x58] sm:$0xff] }
  0xbd   : > { %736 = vmatprep.subr.bf16.mxu0 %v1275_v9 }
  0xc0   : > { %737 = vmatpush1.bf16.msra.mxu0 %v1273_v11  ;;  %v402_v11 = vld [vmem:[%s1807_s20 + $0x48] sm:$0xff] }
  0xc1   : > { %738 = vmatprep.subr.bf16.mxu0 %v1278_v12 }
  0xc3   : > { %1137 = vmatmul.mubr.bf16.gmra.mrb[4].mxu0 %v1265_v22 }
  0xc4   : > { %1140 = vmatprep.mubr.bf16.mxu0 %v1266_v24  ;;  %739 = vmatpush1.bf16.msra.mxu0 %v1276_v14 }
  0xc5   : > { %740 = vmatprep.subr.bf16.mxu0 %v1281_v15 }
  0xc8   : > { %741 = vmatpush1.bf16.msra.mxu0 %v1279_v17 }
  0xc9   : > { %742 = vmatprep.subr.bf16.mxu0 %v1284_v19 }
  0xcb   : > { %1141 = vmatmul.mubr.bf16.gmra.mrb[8].mxu0 %v1267_v25 }
  0xcc   : > { %1144 = vmatprep.mubr.bf16.mxu0 %v1268_v26  ;;  %743 = vmatpush1.bf16.msra.mxu0 %v1282_v20  ;;  %v408_v26 = vld [vmem:[%s1807_s20 + $0x78] sm:$0xff] }
  0xcd   : > { %744 = vmatprep.subr.bf16.mxu0 %v1287_v21  ;;  %v407_v21 = vld [vmem:[%s1807_s20 + $0x70] sm:$0xff] }
  0xd0   : > { %745 = vmatpush1.bf16.msra.mxu0 %v1285_v23  ;;  %v405_v23 = vld [vmem:[%s1807_s20 + $0x60] sm:$0xff] }
  0xd1   : > { %746 = vmatprep.subr.bf16.mxu0 %v1290_v28 }
  0xd3   : > { %1145 = vmatmul.mubr.bf16.gmra.mrb[12].mxu0 %v1269_v27 }
  0xd4   : > { %747 = vmatpush1.bf16.msra.mxu0 %v1288_v29  ;;  %766 = vmatprep.mubr.bf16.mxu0 %v1512_v32  ;;  %v406_v29 = vld [vmem:[%s1807_s20 + $0x68] sm:$0xff] }
  0xd5   : > { %748 = vmatprep.subr.bf16.mxu0 %v1293_v30 }
  0xd8   : > { %749 = vmatpush1.bf16.msra.mxu0 %v1291_v31 }
 0x18e   : > { %v1134_v35 = vpop.f32.mrb[0].mxu0 }
 0x18f   : > { %v548_v37 = vadd.f32 %v1134_v35, %v395_v33  ;;  %v539_v38 = vpop.f32.mrb[1].mxu0 }
 0x190   : > { %v540_v40 = vadd.f32 %v539_v38, %v393_v34  ;;  %v1135_v41 = vpop.f32.mrb[2].mxu0 }
 0x191   : > { %v551_v42 = vadd.f32 %v1135_v41, %v396_v36  ;;  %v542_v43 = vpop.f32.mrb[3].mxu0  ;;  %v604_v45 = vmax.f32 %v548_v37, 0.0 }
 0x192   : > { %v543_v44 = vadd.f32 %v542_v43, %v394_v39  ;;  %v602_v47 = vmax.f32 %v540_v40, 0.0 }
 0x193   : > { %v605_v46 = vmax.f32 %v551_v42, 0.0  ;;  %v644_v42 = vlaneseq }
 0x194   : > { %v603_v48 = vmax.f32 %v543_v44, 0.0 }
 0x195   : > { %v619_v50 = vpack.c.bf16 %v605_v46, %v604_v45  ;;  %v645_v43 = vshrl.u32 %v644_v42, 7  ;;  %v642_v45 = vld [vmem:[%s1987_s4] sm:$0x3] }
 0x196   : > { %v618_v52 = vpack.c.bf16 %v603_v48, %v602_v47  ;;  %v1138_v53 = vpop.f32.mrb[4].mxu0 }
 0x197   : > { %v564_v55 = vadd.f32 %v1138_v53, %v399_v49  ;;  %v555_v56 = vpop.f32.mrb[5].mxu0  ;;  %v646_v44 = vsub.s32 0, %v645_v43  ;;  %v650_v46 = vsub.s32 1, %v645_v43 }
 0x198   : > { %v556_v58 = vadd.f32 %v555_v56, %v397_v51  ;;  %v1139_v59 = vpop.f32.mrb[6].mxu0  ;;  %767 = vmatmul.mubr.bf16.vlgmr.msra.gmra.mrb[16].mxu0 %v618_v52 }
 0x199   : > { %v567_v60 = vadd.f32 %v1139_v59, %v400_v54  ;;  %v558_v61 = vpop.f32.mrb[7].mxu0  ;;  %776 = vmatprep.mubr.bf16.mxu0 %v1512_v32  ;;  %v608_v63 = vmax.f32 %v564_v55, 0.0  ;;  %v1857_v47 = vrot.slane %v642_v45, %v646_v44  ;;  %v1859_v48 = vrot.slane %v642_v45, %v650_v46 }
 0x19a   : > { %v559_v62 = vadd.f32 %v558_v61, %v398_v57  ;;  %v606_v1 = vmax.f32 %v556_v58, 0.0 }
 0x19b   : > { %v609_v0 = vmax.f32 %v567_v60, 0.0 }
 0x19c   : > { %v607_v2 = vmax.f32 %v559_v62, 0.0 }
 0x19d   : > { %v621_v4 = vpack.c.bf16 %v609_v0, %v608_v63 }
 0x19e   : > { %v620_v6 = vpack.c.bf16 %v607_v2, %v606_v1  ;;  %v1142_v7 = vpop.f32.mrb[8].mxu0 }
 0x19f   : > { %v580_v9 = vadd.f32 %v1142_v7, %v403_v3  ;;  %v571_v10 = vpop.f32.mrb[9].mxu0 }
 0x1a0   : > { %777 = vmatmul.mubr.bf16.gmra.mrb[20].mxu0 %v619_v50  ;;  %787 = vmatmul.mubr.bf16.vlgmr.msra.gmra.mrb[0].mxu1 %v620_v6  ;;  %v572_v12 = vadd.f32 %v571_v10, %v401_v5  ;;  %v1143_v13 = vpop.f32.mrb[10].mxu0 }
 0x1a1   : > { %v612_v14 = vmax.f32 %v580_v9, 0.0  ;;  %v583_v15 = vadd.f32 %v1143_v13, %v404_v8  ;;  %v574_v16 = vpop.f32.mrb[11].mxu0  ;;  %796 = vmatprep.mubr.bf16.mxu1 %v1512_v32 }
 0x1a2   : > { %v610_v17 = vmax.f32 %v572_v12, 0.0  ;;  %v575_v18 = vadd.f32 %v574_v16, %v402_v11 }
 0x1a3   : > { %v613_v19 = vmax.f32 %v583_v15, 0.0 }
 0x1a4   : > { %v611_v20 = vmax.f32 %v575_v18, 0.0 }
 0x1a5   : > { %v623_v22 = vpack.c.bf16 %v613_v19, %v612_v14 }
 0x1a6   : > { %v622_v24 = vpack.c.bf16 %v611_v20, %v610_v17  ;;  %v1146_v25 = vpop.f32.mrb[12].mxu0 }
 0x1a7   : > { %v596_v27 = vadd.f32 %v1146_v25, %v407_v21  ;;  %v587_v28 = vpop.f32.mrb[13].mxu0 }
 0x1a8   : > { %797 = vmatmul.mubr.bf16.gmra.mrb[4].mxu1 %v621_v4  ;;  %v588_v30 = vadd.f32 %v587_v28, %v405_v23  ;;  %v1147_v31 = vpop.f32.mrb[14].mxu0 }
 0x1a9   : > { %806 = vmatprep.mubr.bf16.mxu1 %v1512_v32  ;;  %v616_v33 = vmax.f32 %v596_v27, 0.0  ;;  %v599_v34 = vadd.f32 %v1147_v31, %v408_v26  ;;  %v590_v35 = vpop.f32.mrb[15].mxu0 }
 0x1aa   : > { %v614_v36 = vmax.f32 %v588_v30, 0.0  ;;  %v591_v37 = vadd.f32 %v590_v35, %v406_v29 }
 0x1ab   : > { %v617_v38 = vmax.f32 %v599_v34, 0.0 }
 0x1ac   : > { %v615_v39 = vmax.f32 %v591_v37, 0.0 }
 0x1ad   : > { %v625_v40 = vpack.c.bf16 %v617_v38, %v616_v33 }
 0x1ae   : > { %v624_v41 = vpack.c.bf16 %v615_v39, %v614_v36 }
 0x1b0   : > { %807 = vmatmul.mubr.bf16.gmra.mrb[8].mxu1 %v622_v24 }
 0x1b1   : > { %816 = vmatprep.mubr.bf16.mxu1 %v1512_v32 }
 0x1b8   : > { %817 = vmatmul.mubr.bf16.gmra.mrb[12].mxu1 %v623_v22 }
 0x1b9   : > { %826 = vmatprep.mubr.bf16.mxu1 %v1512_v32 }
 0x1c0   : > { %827 = vmatmul.mubr.bf16.gmra.mrb[16].mxu1 %v624_v41 }
 0x1c1   : > { %836 = vmatprep.mubr.bf16.mxu1 %v1512_v32 }
 0x1c8   : > { %837 = vmatmul.mubr.bf16.gmra.mrb[20].mxu1 %v625_v40 }
 0x26b   : > { %v768_v49 = vpop.f32.mrb[16].mxu0 }
 0x26c   : > { %v769_v50 = vadd.f32 %v768_v49, %v1857_v47  ;;  %v770_v51 = vpop.f32.mrb[17].mxu0 }
 0x26d   : > { %v771_v32 = vadd.f32 %v770_v51, %v1859_v48  ;;  %v772_v52 = vpop.f32.mrb[18].mxu0 }
 0x26e   : > { %847 = vst [vmem:[%s1863_s23] sm:$0xff] %v769_v50  ;;  %v773_v53 = vadd.f32 %v772_v52, %v1857_v47  ;;  %v774_v54 = vpop.f32.mrb[19].mxu0 }
 0x26f   : > { %848 = vst [vmem:[%s1863_s23 + $0x8] sm:$0xff] %v771_v32  ;;  %v775_v55 = vadd.f32 %v774_v54, %v1859_v48 }
 0x270   : > { %849 = vst [vmem:[%s1863_s23 + $0x10] sm:$0xff] %v773_v53 }
 0x271   : > { %850 = vst [vmem:[%s1863_s23 + $0x18] sm:$0xff] %v775_v55 }
 0x273   : > { %v778_v56 = vpop.f32.mrb[20].mxu0  ;;  %v788_v57 = vpop.f32.mrb[0].mxu1 }
 0x274   : > { %v779_v58 = vadd.f32 %v778_v56, %v1857_v47  ;;  %v789_v59 = vadd.f32 %v788_v57, %v1857_v47  ;;  %v780_v60 = vpop.f32.mrb[21].mxu0  ;;  %v790_v61 = vpop.f32.mrb[1].mxu1 }
 0x275   : > { %v781_v62 = vadd.f32 %v780_v60, %v1859_v48  ;;  %v791_v63 = vadd.f32 %v790_v61, %v1859_v48  ;;  %v782_v0 = vpop.f32.mrb[22].mxu0  ;;  %v792_v1 = vpop.f32.mrb[2].mxu1 }
 0x276   : > { %851 = vst [vmem:[%s1863_s23 + $0x20] sm:$0xff] %v779_v58  ;;  %855 = vst [vmem:[%s1863_s23 + $0x40] sm:$0xff] %v789_v59  ;;  %v783_v2 = vadd.f32 %v782_v0, %v1857_v47  ;;  %v793_v3 = vadd.f32 %v792_v1, %v1857_v47  ;;  %v784_v4 = vpop.f32.mrb[23].mxu0  ;;  %v794_v5 = vpop.f32.mrb[3].mxu1 }
 0x277   : > { %852 = vst [vmem:[%s1863_s23 + $0x28] sm:$0xff] %v781_v62  ;;  %856 = vst [vmem:[%s1863_s23 + $0x48] sm:$0xff] %v791_v63  ;;  %v785_v6 = vadd.f32 %v784_v4, %v1859_v48  ;;  %v795_v7 = vadd.f32 %v794_v5, %v1859_v48 }
 0x278   : > { %853 = vst [vmem:[%s1863_s23 + $0x30] sm:$0xff] %v783_v2  ;;  %857 = vst [vmem:[%s1863_s23 + $0x50] sm:$0xff] %v793_v3 }
 0x279   : > { %854 = vst [vmem:[%s1863_s23 + $0x38] sm:$0xff] %v785_v6  ;;  %858 = vst [vmem:[%s1863_s23 + $0x58] sm:$0xff] %v795_v7 }
 0x27b   : > { %v798_v8 = vpop.f32.mrb[4].mxu1 }
 0x27c   : > { %v799_v9 = vadd.f32 %v798_v8, %v1857_v47  ;;  %v800_v10 = vpop.f32.mrb[5].mxu1 }
 0x27d   : > { %v801_v11 = vadd.f32 %v800_v10, %v1859_v48  ;;  %v802_v12 = vpop.f32.mrb[6].mxu1 }
 0x27e   : > { %859 = vst [vmem:[%s1863_s23 + $0x60] sm:$0xff] %v799_v9  ;;  %v803_v13 = vadd.f32 %v802_v12, %v1857_v47  ;;  %v804_v14 = vpop.f32.mrb[7].mxu1 }
 0x27f   : > { %860 = vst [vmem:[%s1863_s23 + $0x68] sm:$0xff] %v801_v11  ;;  %v805_v15 = vadd.f32 %v804_v14, %v1859_v48 }
 0x280   : > { %861 = vst [vmem:[%s1863_s23 + $0x70] sm:$0xff] %v803_v13 }
 0x281   : > { %862 = vst [vmem:[%s1863_s23 + $0x78] sm:$0xff] %v805_v15 }
 0x283   : > { %v808_v16 = vpop.f32.mrb[8].mxu1 }
 0x284   : > { %v809_v17 = vadd.f32 %v808_v16, %v1857_v47  ;;  %v810_v18 = vpop.f32.mrb[9].mxu1 }
 0x285   : > { %v811_v19 = vadd.f32 %v810_v18, %v1859_v48  ;;  %v812_v20 = vpop.f32.mrb[10].mxu1 }
 0x286   : > { %863 = vst [vmem:[%s1863_s23 + $0x80] sm:$0xff] %v809_v17  ;;  %v813_v21 = vadd.f32 %v812_v20, %v1857_v47  ;;  %v814_v22 = vpop.f32.mrb[11].mxu1 }
 0x287   : > { %864 = vst [vmem:[%s1863_s23 + $0x88] sm:$0xff] %v811_v19  ;;  %v815_v23 = vadd.f32 %v814_v22, %v1859_v48 }
 0x288   : > { %865 = vst [vmem:[%s1863_s23 + $0x90] sm:$0xff] %v813_v21 }
 0x289   : > { %866 = vst [vmem:[%s1863_s23 + $0x98] sm:$0xff] %v815_v23 }
 0x28b   : > { %v818_v24 = vpop.f32.mrb[12].mxu1 }
 0x28c   : > { %v819_v25 = vadd.f32 %v818_v24, %v1857_v47  ;;  %v820_v26 = vpop.f32.mrb[13].mxu1 }
 0x28d   : > { %v821_v27 = vadd.f32 %v820_v26, %v1859_v48  ;;  %v822_v28 = vpop.f32.mrb[14].mxu1 }
 0x28e   : > { %867 = vst [vmem:[%s1863_s23 + $0xa0] sm:$0xff] %v819_v25  ;;  %v823_v29 = vadd.f32 %v822_v28, %v1857_v47  ;;  %v824_v30 = vpop.f32.mrb[15].mxu1 }
 0x28f   : > { %868 = vst [vmem:[%s1863_s23 + $0xa8] sm:$0xff] %v821_v27  ;;  %v825_v31 = vadd.f32 %v824_v30, %v1859_v48 }
 0x290   : > { %869 = vst [vmem:[%s1863_s23 + $0xb0] sm:$0xff] %v823_v29 }
 0x291   : > { %870 = vst [vmem:[%s1863_s23 + $0xb8] sm:$0xff] %v825_v31 }
 0x293   : > { %v828_v33 = vpop.f32.mrb[16].mxu1 }
 0x294   : > { %v829_v34 = vadd.f32 %v828_v33, %v1857_v47  ;;  %v830_v35 = vpop.f32.mrb[17].mxu1 }
 0x295   : > { %v831_v36 = vadd.f32 %v830_v35, %v1859_v48  ;;  %v832_v37 = vpop.f32.mrb[18].mxu1 }
 0x296   : > { %871 = vst [vmem:[%s1863_s23 + $0xc0] sm:$0xff] %v829_v34  ;;  %v833_v38 = vadd.f32 %v832_v37, %v1857_v47  ;;  %v834_v39 = vpop.f32.mrb[19].mxu1 }
 0x297   : > { %872 = vst [vmem:[%s1863_s23 + $0xc8] sm:$0xff] %v831_v36  ;;  %v835_v40 = vadd.f32 %v834_v39, %v1859_v48 }
 0x298   : > { %873 = vst [vmem:[%s1863_s23 + $0xd0] sm:$0xff] %v833_v38 }
 0x299   : > { %874 = vst [vmem:[%s1863_s23 + $0xd8] sm:$0xff] %v835_v40 }
 0x29b   : > { %v838_v41 = vpop.f32.mrb[20].mxu1 }
 0x29c   : > { %v839_v42 = vadd.f32 %v838_v41, %v1857_v47  ;;  %v840_v43 = vpop.f32.mrb[21].mxu1 }
 0x29d   : > { %v841_v44 = vadd.f32 %v840_v43, %v1859_v48  ;;  %v842_v45 = vpop.f32.mrb[22].mxu1 }
 0x29e   : > { %875 = vst [vmem:[%s1863_s23 + $0xe0] sm:$0xff] %v839_v42  ;;  %v843_v46 = vadd.f32 %v842_v45, %v1857_v47  ;;  %v844_v49 = vpop.f32.mrb[23].mxu1 }
 0x29f   : > { %876 = vst [vmem:[%s1863_s23 + $0xe8] sm:$0xff] %v841_v44  ;;  %v845_v50 = vadd.f32 %v844_v49, %v1859_v48 }
 0x2a0   : > { %877 = vst [vmem:[%s1863_s23 + $0xf0] sm:$0xff] %v843_v46 }
 0x2a1   : > { %878 = vst [vmem:[%s1863_s23 + $0xf8] sm:$0xff] %v845_v50 }
 0x2a2   : > { %1425 = shalt.err (!%p1422_p12)
}
 0x2a3   : > { %s1426_s11 = scalar_lea.hbm %s1928_s12, 4096  ;;  %s1430_s30 = scalar_lea.hbm %s1988_s5, 8192 }
 0x2a4   : > { %p1427_p0 = scmp.ne.s32.totalorder %s1928_s12, %s1426_s11  ;;  %p1431_p1 = scmp.lt.u32.totalorder %s1928_s12, %s1988_s5 }
 0x2a5   : > { %p1432_p4 = scmp.lt.u32.totalorder %s1430_s30, %s1426_s11  ;;  %p1434_p5 = scmp.lt.u32.totalorder %s1426_s11, %s1928_s12 }
 0x2a6   : > { %p1428_p2 = pnand %p1427_p0, %p2031_p10 }
 0x2a7   : > { %p1433_p11 = por %p1432_p4, %p1431_p1 }
 0x2a8   : > { %p1429_p9 = pneg %p1428_p2 }
 0x2a9   : > { %p1435_p13 = por %p1434_p5, %p1433_p11 }
 0x2ab   : > { %p1436_p7 = pnand %p1435_p13, %p1429_p9 }
 0x2ad   : > { %1439 = shalt.err (!%p1436_p7)
}
 0x2ae   : > { %s1514_s18 = smov 256   ;;  %s1515_s20 = smov 16  }
 0x2af   : > { %1174 = dma.vmem_to_hbm [thread:$0]  (%p2031_p10), %s1930_s17, 4096, %s1928_s12, %s880_s21, %s1514_s18, %s1514_s18, %s1515_s20  }
 0x2b0 PF: > { %s2032_s25 = sld [smem:[#allocation15_spill]]  ;;  %s2033_s8 = sld [smem:[#allocation20_spill]] }
 0x2b1   : > { %s2034_s1 = sld [smem:[#allocation17_spill]] }
 0x2b6   : > { %s911_s23 = sand.u32 1, %s2032_s25   ;;  %p2035_p3 = scmp.ne.s32.totalorder %s2033_s8, 0 }
 0x2b7   : > { %p2036_p6 = scmp.ge.s32.totalorder %s2034_s1, 2  ;;  %s912_s24 = scalar_lea.sflag [#allocation4], %s911_s23 }
 0x2b9   : > { %p1191_p8 = pnand %p2036_p6, %p2035_p3 }
 0x2bb   : > { %1477 = dma.done.wait (!%p1191_p8), %s912_s24, 4096  }
 0x2bc   : > { %1479 = vsyncadd (!%p1191_p8), %s912_s24, 4294963200  ;;  %s25_s23 = sadd.s32 1, %s2034_s1   ;;  %s2037_s6 = sld [smem:[#allocation16_spill]] }
 0x2bd   : > { %p22_p12 = scmp.ge.s32.totalorder %s25_s23, 4   ;;  %s2038_s20 = sld [smem:[#allocation19_spill]] }
 0x2be   : > { %s2039_s10 = sld [smem:[#allocation18_spill]]  ;;  %s2040_s18 = smov %s1486_s19 }
 0x2bf   : > { %s2042_s21 = smov %s1498_s22  ;;  %24 = sbr.rel (!%p22_p12) target bundleno = 11 (0xb), region = 113 }
 0x2c2   : > { %s2041_s19 = smov %s2037_s6 }
 0x2c4   : > { %s2043_s22 = smov %s2039_s10 }
 0x2c6   :  { %917 = vsyncpa [#allocation3], 1 }
 0x2c7   :  { %919 = vsyncpa [#allocation3 + $0x1], 1 }
 0x2c8   :  { %920 = vsyncpa [#allocation6], 1 }
 0x2c9   :  { %922 = vsyncpa [#allocation6 + $0x1], 1 }
 0x2ca   :  { %923 = vsyncpa [#allocation9], 1 }
 0x2cb   :  { %924 = vsyncpa [#allocation4], 1 }
 0x2cc   :  { %926 = vsyncpa [#allocation4 + $0x1], 1 }

</bundles_post_ra>
